<compile_context>
chip_gen: v6e
topology: v6e:2x2x1
jax: 0.10.0
libtpu: 0.0.40
codegen_flags: <defaults>
</compile_context>

<pallas_src>
import functools

import jax
import jax.numpy as jnp
from jax import lax
from jax.experimental import pallas as pl
from jax.experimental.pallas import tpu as pltpu


def _round_up(a: int, b: int) -> int:
    return (a + b - 1) // b * b


def _cdiv(a: int, b: int) -> int:
    return (a + b - 1) // b


def _tvmf_stats_kernel(x_ref, t_ref, dot_ref, ss_ref, tt_ref, *,
                       n_classes, apply_softmax, hw_valid, s_tile, needs_mask):
    i = pl.program_id(2)

    @pl.when(i == 0)
    def _():
        dot_ref[...] = jnp.zeros_like(dot_ref)
        ss_ref[...] = jnp.zeros_like(ss_ref)
        tt_ref[...] = jnp.zeros_like(tt_ref)

    labels = t_ref[0]                                    # (s_tile, 128), original dtype
    planes = [x_ref[0, c].astype(jnp.float32) for c in range(n_classes)]

    if apply_softmax:
        m = planes[0]
        for c in range(1, n_classes):
            m = jnp.maximum(m, planes[c])                # elementwise, no XLU
        exps = [jnp.exp(p - m) for p in planes]          # EUP
        denom = exps[0]
        for c in range(1, n_classes):
            denom = denom + exps[c]
        inv = pl.reciprocal(denom)                       # exact: keeps 1e-5 parity
        probs = [e * inv for e in exps]
    else:
        probs = planes

    if needs_mask:
        # Ragged tail: H*W was padded up to S_pad*128.  Build an explicit
        # validity mask so no statistic depends on the pad values.  This is
        # compiled in only for shapes where padding actually exists.
        shard = pl.program_id(1)
        base = (shard * pl.num_programs(2) + i) * s_tile
        row = lax.broadcasted_iota(jnp.int32, (s_tile, 128), 0)
        lane = lax.broadcasted_iota(jnp.int32, (s_tile, 128), 1)
        valid = (base + row) * 128 + lane < hw_valid
    else:
        valid = None

    for c in range(n_classes):
        p_c = probs[c]
        hit = labels == c                                # scalar class compare
        if valid is not None:
            hit = jnp.logical_and(hit, valid)
            p_c = jnp.where(valid, p_c, 0.0)
        dot_ref[0, 0, c:c + 1, :] += jnp.sum(
            jnp.where(hit, p_c, 0.0), axis=0, keepdims=True)
        ss_ref[0, 0, c:c + 1, :] += jnp.sum(p_c * p_c, axis=0, keepdims=True)
        tt_ref[0, 0, c:c + 1, :] += jnp.sum(
            hit.astype(jnp.float32), axis=0, keepdims=True)


def _pick_tiling(hw, n_classes, in_itemsize, block_bytes, vmem_budget):
    """Returns (S_pad, s_tile): padded sublane-row count and rows per tile."""
    s = _cdiv(hw, 128)
    # Per sublane-row VMEM bytes: double-buffered inputs (logits + labels)
    # plus the live f32 temporaries (~C prob planes + max/denom/mask).
    per_row = 128 * (2 * (n_classes * in_itemsize + 4) + (n_classes + 3) * 4)
    max_rows = max(8, (vmem_budget // per_row) // 8 * 8)
    target = max(8, (block_bytes // (n_classes * 128 * in_itemsize)) // 8 * 8)
    target = min(target, max_rows)
    if s <= target:
        return s, s                       # single spatial tile (full-dim block)
    for cand in range(target, 7, -8):     # largest mult-of-8 divisor -> no pad
        if s % cand == 0:
            return s, cand
    return _round_up(s, target), target   # rare fallback: pad S up to a tile


def adaptive_tvmf_dice_loss(inputs, target, kappa, softmax=True,
                            block_bytes=8 * 1024 * 1024,
                            vmem_budget=48 * 1024 * 1024):
    """inputs: (B, C, H, W) float logits (f32/bf16); target: (B, H, W) int
    labels; kappa: (C,) float.  Returns scalar loss (mean over classes)."""
    B, C, H, W = inputs.shape
    assert target.shape == (B, H, W)
    HW = H * W

    in_itemsize = jnp.dtype(inputs.dtype).itemsize
    S_pad, s_tile = _pick_tiling(HW, C, in_itemsize, block_bytes, vmem_budget)
    HW_pad = S_pad * 128
    needs_mask = HW_pad != HW

    x = inputs.reshape(B, C, HW)          # free reshapes of contiguous dims
    t = target.reshape(B, HW)             # keep original dtype; compare in-kernel
    if needs_mask:
        # TODO(synk): this pad is one extra HBM round trip; it is taken only
        # when H*W is not a multiple of 128 (or S has no usable divisor),
        # which never happens for the usual power-of-two segmentation shapes.
        x = jnp.pad(x, ((0, 0), (0, 0), (0, HW_pad - HW)))
        t = jnp.pad(t, ((0, 0), (0, HW_pad - HW)))
    x = x.reshape(B, C, S_pad, 128)
    t = t.reshape(B, S_pad, 128)

    n_tiles = S_pad // s_tile
    P = 2 if (n_tiles % 2 == 0 and n_tiles >= 2) else 1   # spatial shards (v7x)
    T = n_tiles // P
    grid = (B, P, T)

    kernel = functools.partial(
        _tvmf_stats_kernel,
        n_classes=C, apply_softmax=softmax, hw_valid=HW,
        s_tile=s_tile, needs_mask=needs_mask)

    out_sds = jax.ShapeDtypeStruct((B, P, C, 128), jnp.float32)
    out_spec = pl.BlockSpec((1, 1, C, 128), lambda b, p, i: (b, p, 0, 0))

    # VMEM accounting with *padded* tile sizes + double buffering + temps.
    def _padded_bytes(rows, itemsize):
        return _round_up(rows, max(8, 32 // itemsize)) * 128 * itemsize
    t_itemsize = jnp.dtype(t.dtype).itemsize
    x_blk = C * _padded_bytes(s_tile, in_itemsize)
    t_blk = _padded_bytes(s_tile, t_itemsize)
    temps = (C + 3) * _padded_bytes(s_tile, 4)
    out_blk = 3 * 2 * _round_up(C, 8) * 128 * 4
    vmem_est = 2 * (x_blk + t_blk) + temps + out_blk
    vmem_limit = int(min(56 << 20, max(32 << 20, vmem_est + (8 << 20))))

    dot, ss, tt = pl.pallas_call(
        kernel,
        out_shape=(out_sds, out_sds, out_sds),
        grid_spec=pltpu.PrefetchScalarGridSpec(
            num_scalar_prefetch=0,
            grid=grid,
            in_specs=[
                pl.BlockSpec((1, C, s_tile, 128),
                             lambda b, p, i: (b, 0, p * T + i, 0)),
                pl.BlockSpec((1, s_tile, 128),
                             lambda b, p, i: (b, p * T + i, 0)),
            ],
            out_specs=(out_spec, out_spec, out_spec),
        ),
        compiler_params=pltpu.CompilerParams(
            # batch + spatial shard write disjoint output blocks -> parallel
            # (megacore / v7x two TCs); spatial reduction axis stays arbitrary.
            dimension_semantics=("parallel", "parallel", "arbitrary"),
            vmem_limit_bytes=vmem_limit,
        ),
    )(x, t)

    # Tiny epilogue in plain JAX: reduce lane partials, shards and batch,
    # then the per-class tvMF-dice scalar combination.
    dot = jnp.sum(dot, axis=(0, 1, 3))    # (C,)
    ss = jnp.sum(ss, axis=(0, 1, 3))
    tt = jnp.sum(tt, axis=(0, 1, 3))

    eps = 1e-12                           # F.normalize's clamp_min eps
    kappa = kappa.astype(jnp.float32)
    cosine = dot / (jnp.maximum(jnp.sqrt(ss), eps) * jnp.maximum(jnp.sqrt(tt), eps))
    intersect = (1.0 + cosine) / (1.0 + (1.0 - cosine) * kappa) - 1.0
    per_class_loss = (1.0 - intersect) ** 2.0
    return jnp.mean(per_class_loss)       # sum_i loss_i / n_classes


def _reference_loss(inputs, target, kappa):
    """Pure-JAX re-implementation of the PyTorch forward (sanity check)."""
    C = inputs.shape[1]
    p = jax.nn.softmax(inputs, axis=1)
    oh = jax.nn.one_hot(target, C, axis=1, dtype=jnp.float32)
    loss = 0.0
    for i in range(C):
        s = p[:, i]
        t = oh[:, i]
        sn = s / jnp.maximum(jnp.sqrt(jnp.sum(s * s)), 1e-12)
        tn = t / jnp.maximum(jnp.sqrt(jnp.sum(t * t)), 1e-12)
        cos = jnp.sum(sn * tn)
        inter = (1.0 + cos) / (1.0 + (1.0 - cos) * kappa[i]) - 1.0
        loss = loss + (1.0 - inter) ** 2.0
    return loss / C


if __name__ == "__main__":
    key = jax.random.PRNGKey(0)
    k1, k2 = jax.random.split(key)

    B, C, H, W = 2, 4, 16, 16
    inputs = jax.random.normal(k1, (B, C, H, W), dtype=jnp.float32)
    target = jax.random.randint(k2, (B, H, W), 0, C, dtype=jnp.int32)
    # deterministic per-class kappa (the module takes it as a forward arg)
    kappa = jnp.array([1.0, 2.0, 4.0, 8.0], dtype=jnp.float32)

    loss = adaptive_tvmf_dice_loss(inputs, target, kappa, softmax=True)
    loss = jax.block_until_ready(loss)

    ref = jax.block_until_ready(_reference_loss(inputs, target, kappa))
    assert jnp.allclose(loss, ref, atol=1e-5, rtol=1e-5), (loss, ref)

    print("KERNEL_OK")
</pallas_src>

<mosaic_0001>
module attributes {stable_mosaic.version = 11 : i64} {
  func.func @_tvmf_stats_kernel(%arg0: i32, %arg1: i32, %arg2: i32, %arg3: memref<1x4x2x128xf32, #tpu.memory_space<vmem>>, %arg4: memref<1x2x128xi32, #tpu.memory_space<vmem>>, %arg5: memref<1x1x4x128xf32, #tpu.memory_space<vmem>>, %arg6: memref<1x1x4x128xf32, #tpu.memory_space<vmem>>, %arg7: memref<1x1x4x128xf32, #tpu.memory_space<vmem>>) attributes {dimension_semantics = [#tpu.dimension_semantics<parallel>, #tpu.dimension_semantics<parallel>, #tpu.dimension_semantics<arbitrary>], iteration_bounds = array<i64: 2, 1, 1>, scalar_prefetch = 0 : i64, scratch_operands = 0 : i64, tpu.core_type = #tpu.core_type<tc>, window_params = [{transform_indices = @transform_0, window_bounds = array<i64: 1, 4, 2, 128>}, {transform_indices = @transform_1, window_bounds = array<i64: 1, 2, 128>}, {transform_indices = @transform_2, window_bounds = array<i64: 1, 1, 4, 128>}, {transform_indices = @transform_3, window_bounds = array<i64: 1, 1, 4, 128>}, {transform_indices = @transform_4, window_bounds = array<i64: 1, 1, 4, 128>}]} {
    %c0_i32 = arith.constant 0 : i32
    %0 = arith.cmpi eq, %arg2, %c0_i32 : i32
    %1 = arith.extui %0 : i1 to i32
    %c0_i32_0 = arith.constant 0 : i32
    %2 = arith.cmpi ne, %1, %c0_i32_0 : i32
    scf.if %2 {
      %cst_128 = arith.constant 0.000000e+00 : f32
      %156 = vector.broadcast %cst_128 : f32 to vector<1x1x4x128xf32>
      %c0_129 = arith.constant 0 : index
      %c0_130 = arith.constant 0 : index
      %c0_131 = arith.constant 0 : index
      %c0_132 = arith.constant 0 : index
      %157 = vector.load %arg5[%c0_129, %c0_130, %c0_131, %c0_132] : memref<1x1x4x128xf32, #tpu.memory_space<vmem>>, vector<1x1x4x128xf32>
      tpu.vector_store %arg5[%c0_129, %c0_130, %c0_131, %c0_132], %156 {strides = array<i32>} : memref<1x1x4x128xf32, #tpu.memory_space<vmem>>, vector<1x1x4x128xf32>,
      %cst_133 = arith.constant 0.000000e+00 : f32
      %158 = vector.broadcast %cst_133 : f32 to vector<1x1x4x128xf32>
      %c0_134 = arith.constant 0 : index
      %c0_135 = arith.constant 0 : index
      %c0_136 = arith.constant 0 : index
      %c0_137 = arith.constant 0 : index
      %159 = vector.load %arg6[%c0_134, %c0_135, %c0_136, %c0_137] : memref<1x1x4x128xf32, #tpu.memory_space<vmem>>, vector<1x1x4x128xf32>
      tpu.vector_store %arg6[%c0_134, %c0_135, %c0_136, %c0_137], %158 {strides = array<i32>} : memref<1x1x4x128xf32, #tpu.memory_space<vmem>>, vector<1x1x4x128xf32>,
      %cst_138 = arith.constant 0.000000e+00 : f32
      %160 = vector.broadcast %cst_138 : f32 to vector<1x1x4x128xf32>
      %c0_139 = arith.constant 0 : index
      %c0_140 = arith.constant 0 : index
      %c0_141 = arith.constant 0 : index
      %c0_142 = arith.constant 0 : index
      %161 = vector.load %arg7[%c0_139, %c0_140, %c0_141, %c0_142] : memref<1x1x4x128xf32, #tpu.memory_space<vmem>>, vector<1x1x4x128xf32>
      tpu.vector_store %arg7[%c0_139, %c0_140, %c0_141, %c0_142], %160 {strides = array<i32>} : memref<1x1x4x128xf32, #tpu.memory_space<vmem>>, vector<1x1x4x128xf32>,
    } else {
    }
    %c0 = arith.constant 0 : index
    %c0_1 = arith.constant 0 : index
    %c0_2 = arith.constant 0 : index
    %3 = vector.load %arg4[%c0, %c0_1, %c0_2] : memref<1x2x128xi32, #tpu.memory_space<vmem>>, vector<1x2x128xi32>
    %4 = vector.shape_cast %3 : vector<1x2x128xi32> to vector<2x128xi32>
    %c0_3 = arith.constant 0 : index
    %c0_4 = arith.constant 0 : index
    %c0_5 = arith.constant 0 : index
    %c0_6 = arith.constant 0 : index
    %5 = vector.load %arg3[%c0_3, %c0_4, %c0_5, %c0_6] : memref<1x4x2x128xf32, #tpu.memory_space<vmem>>, vector<1x1x2x128xf32>
    %6 = vector.shape_cast %5 : vector<1x1x2x128xf32> to vector<2x128xf32>
    %c0_7 = arith.constant 0 : index
    %c1 = arith.constant 1 : index
    %c0_8 = arith.constant 0 : index
    %c0_9 = arith.constant 0 : index
    %7 = vector.load %arg3[%c0_7, %c1, %c0_8, %c0_9] : memref<1x4x2x128xf32, #tpu.memory_space<vmem>>, vector<1x1x2x128xf32>
    %8 = vector.shape_cast %7 : vector<1x1x2x128xf32> to vector<2x128xf32>
    %c0_10 = arith.constant 0 : index
    %c2 = arith.constant 2 : index
    %c0_11 = arith.constant 0 : index
    %c0_12 = arith.constant 0 : index
    %9 = vector.load %arg3[%c0_10, %c2, %c0_11, %c0_12] : memref<1x4x2x128xf32, #tpu.memory_space<vmem>>, vector<1x1x2x128xf32>
    %10 = vector.shape_cast %9 : vector<1x1x2x128xf32> to vector<2x128xf32>
    %c0_13 = arith.constant 0 : index
    %c3 = arith.constant 3 : index
    %c0_14 = arith.constant 0 : index
    %c0_15 = arith.constant 0 : index
    %11 = vector.load %arg3[%c0_13, %c3, %c0_14, %c0_15] : memref<1x4x2x128xf32, #tpu.memory_space<vmem>>, vector<1x1x2x128xf32>
    %12 = vector.shape_cast %11 : vector<1x1x2x128xf32> to vector<2x128xf32>
    %13 = arith.maximumf %6, %8 : vector<2x128xf32>
    %14 = arith.maximumf %13, %10 : vector<2x128xf32>
    %15 = arith.maximumf %14, %12 : vector<2x128xf32>
    %16 = arith.subf %6, %15 : vector<2x128xf32>
    %17 = math.exp %16 : vector<2x128xf32>
    %18 = arith.subf %8, %15 : vector<2x128xf32>
    %19 = math.exp %18 : vector<2x128xf32>
    %20 = arith.subf %10, %15 : vector<2x128xf32>
    %21 = math.exp %20 : vector<2x128xf32>
    %22 = arith.subf %12, %15 : vector<2x128xf32>
    %23 = math.exp %22 : vector<2x128xf32>
    %24 = arith.addf %17, %19 : vector<2x128xf32>
    %25 = arith.addf %24, %21 : vector<2x128xf32>
    %26 = arith.addf %25, %23 : vector<2x128xf32>
    %27 = tpu.reciprocal %26 : vector<2x128xf32> -> vector<2x128xf32>
    %28 = arith.mulf %17, %27 : vector<2x128xf32>
    %29 = arith.mulf %19, %27 : vector<2x128xf32>
    %30 = arith.mulf %21, %27 : vector<2x128xf32>
    %31 = arith.mulf %23, %27 : vector<2x128xf32>
    %c0_i32_16 = arith.constant 0 : i32
    %32 = vector.broadcast %c0_i32_16 : i32 to vector<2x128xi32>
    %33 = arith.cmpi eq, %4, %32 : vector<2x128xi32>
    %c0_17 = arith.constant 0 : index
    %c0_18 = arith.constant 0 : index
    %c0_19 = arith.constant 0 : index
    %c0_20 = arith.constant 0 : index
    %34 = vector.load %arg5[%c0_17, %c0_18, %c0_19, %c0_20] : memref<1x1x4x128xf32, #tpu.memory_space<vmem>>, vector<1x1x1x128xf32>
    %35 = vector.shape_cast %34 : vector<1x1x1x128xf32> to vector<1x128xf32>
    %cst = arith.constant 0.000000e+00 : f32
    %36 = vector.broadcast %cst : f32 to vector<2x128xf32>
    %37 = arith.select %33, %28, %36 : vector<2x128xi1>, vector<2x128xf32>
    %cst_21 = arith.constant dense<0.000000e+00> : vector<128xf32>
    %38 = vector.multi_reduction <add>, %37, %cst_21 [0] : vector<2x128xf32> to vector<128xf32>
    %39 = vector.shape_cast %38 : vector<128xf32> to vector<1x128xf32>
    %40 = arith.addf %35, %39 : vector<1x128xf32>
    %c0_22 = arith.constant 0 : index
    %c0_23 = arith.constant 0 : index
    %c0_24 = arith.constant 0 : index
    %c0_25 = arith.constant 0 : index
    %41 = vector.load %arg5[%c0_22, %c0_23, %c0_24, %c0_25] : memref<1x1x4x128xf32, #tpu.memory_space<vmem>>, vector<1x1x1x128xf32>
    %42 = vector.shape_cast %41 : vector<1x1x1x128xf32> to vector<1x128xf32>
    %43 = vector.shape_cast %40 : vector<1x128xf32> to vector<1x1x1x128xf32>
    tpu.vector_store %arg5[%c0_22, %c0_23, %c0_24, %c0_25], %43 {strides = array<i32>} : memref<1x1x4x128xf32, #tpu.memory_space<vmem>>, vector<1x1x1x128xf32>,
    %c0_26 = arith.constant 0 : index
    %c0_27 = arith.constant 0 : index
    %c0_28 = arith.constant 0 : index
    %c0_29 = arith.constant 0 : index
    %44 = vector.load %arg6[%c0_26, %c0_27, %c0_28, %c0_29] : memref<1x1x4x128xf32, #tpu.memory_space<vmem>>, vector<1x1x1x128xf32>
    %45 = vector.shape_cast %44 : vector<1x1x1x128xf32> to vector<1x128xf32>
    %46 = arith.mulf %28, %28 : vector<2x128xf32>
    %cst_30 = arith.constant dense<0.000000e+00> : vector<128xf32>
    %47 = vector.multi_reduction <add>, %46, %cst_30 [0] : vector<2x128xf32> to vector<128xf32>
    %48 = vector.shape_cast %47 : vector<128xf32> to vector<1x128xf32>
    %49 = arith.addf %45, %48 : vector<1x128xf32>
    %c0_31 = arith.constant 0 : index
    %c0_32 = arith.constant 0 : index
    %c0_33 = arith.constant 0 : index
    %c0_34 = arith.constant 0 : index
    %50 = vector.load %arg6[%c0_31, %c0_32, %c0_33, %c0_34] : memref<1x1x4x128xf32, #tpu.memory_space<vmem>>, vector<1x1x1x128xf32>
    %51 = vector.shape_cast %50 : vector<1x1x1x128xf32> to vector<1x128xf32>
    %52 = vector.shape_cast %49 : vector<1x128xf32> to vector<1x1x1x128xf32>
    tpu.vector_store %arg6[%c0_31, %c0_32, %c0_33, %c0_34], %52 {strides = array<i32>} : memref<1x1x4x128xf32, #tpu.memory_space<vmem>>, vector<1x1x1x128xf32>,
    %c0_35 = arith.constant 0 : index
    %c0_36 = arith.constant 0 : index
    %c0_37 = arith.constant 0 : index
    %c0_38 = arith.constant 0 : index
    %53 = vector.load %arg7[%c0_35, %c0_36, %c0_37, %c0_38] : memref<1x1x4x128xf32, #tpu.memory_space<vmem>>, vector<1x1x1x128xf32>
    %54 = vector.shape_cast %53 : vector<1x1x1x128xf32> to vector<1x128xf32>
    %55 = arith.extui %33 : vector<2x128xi1> to vector<2x128xi32>
    %56 = arith.sitofp %55 : vector<2x128xi32> to vector<2x128xf32>
    %cst_39 = arith.constant dense<0.000000e+00> : vector<128xf32>
    %57 = vector.multi_reduction <add>, %56, %cst_39 [0] : vector<2x128xf32> to vector<128xf32>
    %58 = vector.shape_cast %57 : vector<128xf32> to vector<1x128xf32>
    %59 = arith.addf %54, %58 : vector<1x128xf32>
    %c0_40 = arith.constant 0 : index
    %c0_41 = arith.constant 0 : index
    %c0_42 = arith.constant 0 : index
    %c0_43 = arith.constant 0 : index
    %60 = vector.load %arg7[%c0_40, %c0_41, %c0_42, %c0_43] : memref<1x1x4x128xf32, #tpu.memory_space<vmem>>, vector<1x1x1x128xf32>
    %61 = vector.shape_cast %60 : vector<1x1x1x128xf32> to vector<1x128xf32>
    %62 = vector.shape_cast %59 : vector<1x128xf32> to vector<1x1x1x128xf32>
    tpu.vector_store %arg7[%c0_40, %c0_41, %c0_42, %c0_43], %62 {strides = array<i32>} : memref<1x1x4x128xf32, #tpu.memory_space<vmem>>, vector<1x1x1x128xf32>,
    %c1_i32 = arith.constant 1 : i32
    %63 = vector.broadcast %c1_i32 : i32 to vector<2x128xi32>
    %64 = arith.cmpi eq, %4, %63 : vector<2x128xi32>
    %c0_44 = arith.constant 0 : index
    %c0_45 = arith.constant 0 : index
    %c1_46 = arith.constant 1 : index
    %c0_47 = arith.constant 0 : index
    %65 = vector.load %arg5[%c0_44, %c0_45, %c1_46, %c0_47] : memref<1x1x4x128xf32, #tpu.memory_space<vmem>>, vector<1x1x1x128xf32>
    %66 = vector.shape_cast %65 : vector<1x1x1x128xf32> to vector<1x128xf32>
    %cst_48 = arith.constant 0.000000e+00 : f32
    %67 = vector.broadcast %cst_48 : f32 to vector<2x128xf32>
    %68 = arith.select %64, %29, %67 : vector<2x128xi1>, vector<2x128xf32>
    %cst_49 = arith.constant dense<0.000000e+00> : vector<128xf32>
    %69 = vector.multi_reduction <add>, %68, %cst_49 [0] : vector<2x128xf32> to vector<128xf32>
    %70 = vector.shape_cast %69 : vector<128xf32> to vector<1x128xf32>
    %71 = arith.addf %66, %70 : vector<1x128xf32>
    %c0_50 = arith.constant 0 : index
    %c0_51 = arith.constant 0 : index
    %c1_52 = arith.constant 1 : index
    %c0_53 = arith.constant 0 : index
    %72 = vector.load %arg5[%c0_50, %c0_51, %c1_52, %c0_53] : memref<1x1x4x128xf32, #tpu.memory_space<vmem>>, vector<1x1x1x128xf32>
    %73 = vector.shape_cast %72 : vector<1x1x1x128xf32> to vector<1x128xf32>
    %74 = vector.shape_cast %71 : vector<1x128xf32> to vector<1x1x1x128xf32>
    tpu.vector_store %arg5[%c0_50, %c0_51, %c1_52, %c0_53], %74 {strides = array<i32>} : memref<1x1x4x128xf32, #tpu.memory_space<vmem>>, vector<1x1x1x128xf32>,
    %c0_54 = arith.constant 0 : index
    %c0_55 = arith.constant 0 : index
    %c1_56 = arith.constant 1 : index
    %c0_57 = arith.constant 0 : index
    %75 = vector.load %arg6[%c0_54, %c0_55, %c1_56, %c0_57] : memref<1x1x4x128xf32, #tpu.memory_space<vmem>>, vector<1x1x1x128xf32>
    %76 = vector.shape_cast %75 : vector<1x1x1x128xf32> to vector<1x128xf32>
    %77 = arith.mulf %29, %29 : vector<2x128xf32>
    %cst_58 = arith.constant dense<0.000000e+00> : vector<128xf32>
    %78 = vector.multi_reduction <add>, %77, %cst_58 [0] : vector<2x128xf32> to vector<128xf32>
    %79 = vector.shape_cast %78 : vector<128xf32> to vector<1x128xf32>
    %80 = arith.addf %76, %79 : vector<1x128xf32>
    %c0_59 = arith.constant 0 : index
    %c0_60 = arith.constant 0 : index
    %c1_61 = arith.constant 1 : index
    %c0_62 = arith.constant 0 : index
    %81 = vector.load %arg6[%c0_59, %c0_60, %c1_61, %c0_62] : memref<1x1x4x128xf32, #tpu.memory_space<vmem>>, vector<1x1x1x128xf32>
    %82 = vector.shape_cast %81 : vector<1x1x1x128xf32> to vector<1x128xf32>
    %83 = vector.shape_cast %80 : vector<1x128xf32> to vector<1x1x1x128xf32>
    tpu.vector_store %arg6[%c0_59, %c0_60, %c1_61, %c0_62], %83 {strides = array<i32>} : memref<1x1x4x128xf32, #tpu.memory_space<vmem>>, vector<1x1x1x128xf32>,
    %c0_63 = arith.constant 0 : index
    %c0_64 = arith.constant 0 : index
    %c1_65 = arith.constant 1 : index
    %c0_66 = arith.constant 0 : index
    %84 = vector.load %arg7[%c0_63, %c0_64, %c1_65, %c0_66] : memref<1x1x4x128xf32, #tpu.memory_space<vmem>>, vector<1x1x1x128xf32>
    %85 = vector.shape_cast %84 : vector<1x1x1x128xf32> to vector<1x128xf32>
    %86 = arith.extui %64 : vector<2x128xi1> to vector<2x128xi32>
    %87 = arith.sitofp %86 : vector<2x128xi32> to vector<2x128xf32>
    %cst_67 = arith.constant dense<0.000000e+00> : vector<128xf32>
    %88 = vector.multi_reduction <add>, %87, %cst_67 [0] : vector<2x128xf32> to vector<128xf32>
    %89 = vector.shape_cast %88 : vector<128xf32> to vector<1x128xf32>
    %90 = arith.addf %85, %89 : vector<1x128xf32>
    %c0_68 = arith.constant 0 : index
    %c0_69 = arith.constant 0 : index
    %c1_70 = arith.constant 1 : index
    %c0_71 = arith.constant 0 : index
    %91 = vector.load %arg7[%c0_68, %c0_69, %c1_70, %c0_71] : memref<1x1x4x128xf32, #tpu.memory_space<vmem>>, vector<1x1x1x128xf32>
    %92 = vector.shape_cast %91 : vector<1x1x1x128xf32> to vector<1x128xf32>
    %93 = vector.shape_cast %90 : vector<1x128xf32> to vector<1x1x1x128xf32>
    tpu.vector_store %arg7[%c0_68, %c0_69, %c1_70, %c0_71], %93 {strides = array<i32>} : memref<1x1x4x128xf32, #tpu.memory_space<vmem>>, vector<1x1x1x128xf32>,
    %c2_i32 = arith.constant 2 : i32
    %94 = vector.broadcast %c2_i32 : i32 to vector<2x128xi32>
    %95 = arith.cmpi eq, %4, %94 : vector<2x128xi32>
    %c0_72 = arith.constant 0 : index
    %c0_73 = arith.constant 0 : index
    %c2_74 = arith.constant 2 : index
    %c0_75 = arith.constant 0 : index
    %96 = vector.load %arg5[%c0_72, %c0_73, %c2_74, %c0_75] : memref<1x1x4x128xf32, #tpu.memory_space<vmem>>, vector<1x1x1x128xf32>
    %97 = vector.shape_cast %96 : vector<1x1x1x128xf32> to vector<1x128xf32>
    %cst_76 = arith.constant 0.000000e+00 : f32
    %98 = vector.broadcast %cst_76 : f32 to vector<2x128xf32>
    %99 = arith.select %95, %30, %98 : vector<2x128xi1>, vector<2x128xf32>
    %cst_77 = arith.constant dense<0.000000e+00> : vector<128xf32>
    %100 = vector.multi_reduction <add>, %99, %cst_77 [0] : vector<2x128xf32> to vector<128xf32>
    %101 = vector.shape_cast %100 : vector<128xf32> to vector<1x128xf32>
    %102 = arith.addf %97, %101 : vector<1x128xf32>
    %c0_78 = arith.constant 0 : index
    %c0_79 = arith.constant 0 : index
    %c2_80 = arith.constant 2 : index
    %c0_81 = arith.constant 0 : index
    %103 = vector.load %arg5[%c0_78, %c0_79, %c2_80, %c0_81] : memref<1x1x4x128xf32, #tpu.memory_space<vmem>>, vector<1x1x1x128xf32>
    %104 = vector.shape_cast %103 : vector<1x1x1x128xf32> to vector<1x128xf32>
    %105 = vector.shape_cast %102 : vector<1x128xf32> to vector<1x1x1x128xf32>
    tpu.vector_store %arg5[%c0_78, %c0_79, %c2_80, %c0_81], %105 {strides = array<i32>} : memref<1x1x4x128xf32, #tpu.memory_space<vmem>>, vector<1x1x1x128xf32>,
    %c0_82 = arith.constant 0 : index
    %c0_83 = arith.constant 0 : index
    %c2_84 = arith.constant 2 : index
    %c0_85 = arith.constant 0 : index
    %106 = vector.load %arg6[%c0_82, %c0_83, %c2_84, %c0_85] : memref<1x1x4x128xf32, #tpu.memory_space<vmem>>, vector<1x1x1x128xf32>
    %107 = vector.shape_cast %106 : vector<1x1x1x128xf32> to vector<1x128xf32>
    %108 = arith.mulf %30, %30 : vector<2x128xf32>
    %cst_86 = arith.constant dense<0.000000e+00> : vector<128xf32>
    %109 = vector.multi_reduction <add>, %108, %cst_86 [0] : vector<2x128xf32> to vector<128xf32>
    %110 = vector.shape_cast %109 : vector<128xf32> to vector<1x128xf32>
    %111 = arith.addf %107, %110 : vector<1x128xf32>
    %c0_87 = arith.constant 0 : index
    %c0_88 = arith.constant 0 : index
    %c2_89 = arith.constant 2 : index
    %c0_90 = arith.constant 0 : index
    %112 = vector.load %arg6[%c0_87, %c0_88, %c2_89, %c0_90] : memref<1x1x4x128xf32, #tpu.memory_space<vmem>>, vector<1x1x1x128xf32>
    %113 = vector.shape_cast %112 : vector<1x1x1x128xf32> to vector<1x128xf32>
    %114 = vector.shape_cast %111 : vector<1x128xf32> to vector<1x1x1x128xf32>
    tpu.vector_store %arg6[%c0_87, %c0_88, %c2_89, %c0_90], %114 {strides = array<i32>} : memref<1x1x4x128xf32, #tpu.memory_space<vmem>>, vector<1x1x1x128xf32>,
    %c0_91 = arith.constant 0 : index
    %c0_92 = arith.constant 0 : index
    %c2_93 = arith.constant 2 : index
    %c0_94 = arith.constant 0 : index
    %115 = vector.load %arg7[%c0_91, %c0_92, %c2_93, %c0_94] : memref<1x1x4x128xf32, #tpu.memory_space<vmem>>, vector<1x1x1x128xf32>
    %116 = vector.shape_cast %115 : vector<1x1x1x128xf32> to vector<1x128xf32>
    %117 = arith.extui %95 : vector<2x128xi1> to vector<2x128xi32>
    %118 = arith.sitofp %117 : vector<2x128xi32> to vector<2x128xf32>
    %cst_95 = arith.constant dense<0.000000e+00> : vector<128xf32>
    %119 = vector.multi_reduction <add>, %118, %cst_95 [0] : vector<2x128xf32> to vector<128xf32>
    %120 = vector.shape_cast %119 : vector<128xf32> to vector<1x128xf32>
    %121 = arith.addf %116, %120 : vector<1x128xf32>
    %c0_96 = arith.constant 0 : index
    %c0_97 = arith.constant 0 : index
    %c2_98 = arith.constant 2 : index
    %c0_99 = arith.constant 0 : index
    %122 = vector.load %arg7[%c0_96, %c0_97, %c2_98, %c0_99] : memref<1x1x4x128xf32, #tpu.memory_space<vmem>>, vector<1x1x1x128xf32>
    %123 = vector.shape_cast %122 : vector<1x1x1x128xf32> to vector<1x128xf32>
    %124 = vector.shape_cast %121 : vector<1x128xf32> to vector<1x1x1x128xf32>
    tpu.vector_store %arg7[%c0_96, %c0_97, %c2_98, %c0_99], %124 {strides = array<i32>} : memref<1x1x4x128xf32, #tpu.memory_space<vmem>>, vector<1x1x1x128xf32>,
    %c3_i32 = arith.constant 3 : i32
    %125 = vector.broadcast %c3_i32 : i32 to vector<2x128xi32>
    %126 = arith.cmpi eq, %4, %125 : vector<2x128xi32>
    %c0_100 = arith.constant 0 : index
    %c0_101 = arith.constant 0 : index
    %c3_102 = arith.constant 3 : index
    %c0_103 = arith.constant 0 : index
    %127 = vector.load %arg5[%c0_100, %c0_101, %c3_102, %c0_103] : memref<1x1x4x128xf32, #tpu.memory_space<vmem>>, vector<1x1x1x128xf32>
    %128 = vector.shape_cast %127 : vector<1x1x1x128xf32> to vector<1x128xf32>
    %cst_104 = arith.constant 0.000000e+00 : f32
    %129 = vector.broadcast %cst_104 : f32 to vector<2x128xf32>
    %130 = arith.select %126, %31, %129 : vector<2x128xi1>, vector<2x128xf32>
    %cst_105 = arith.constant dense<0.000000e+00> : vector<128xf32>
    %131 = vector.multi_reduction <add>, %130, %cst_105 [0] : vector<2x128xf32> to vector<128xf32>
    %132 = vector.shape_cast %131 : vector<128xf32> to vector<1x128xf32>
    %133 = arith.addf %128, %132 : vector<1x128xf32>
    %c0_106 = arith.constant 0 : index
    %c0_107 = arith.constant 0 : index
    %c3_108 = arith.constant 3 : index
    %c0_109 = arith.constant 0 : index
    %134 = vector.load %arg5[%c0_106, %c0_107, %c3_108, %c0_109] : memref<1x1x4x128xf32, #tpu.memory_space<vmem>>, vector<1x1x1x128xf32>
    %135 = vector.shape_cast %134 : vector<1x1x1x128xf32> to vector<1x128xf32>
    %136 = vector.shape_cast %133 : vector<1x128xf32> to vector<1x1x1x128xf32>
    tpu.vector_store %arg5[%c0_106, %c0_107, %c3_108, %c0_109], %136 {strides = array<i32>} : memref<1x1x4x128xf32, #tpu.memory_space<vmem>>, vector<1x1x1x128xf32>,
    %c0_110 = arith.constant 0 : index
    %c0_111 = arith.constant 0 : index
    %c3_112 = arith.constant 3 : index
    %c0_113 = arith.constant 0 : index
    %137 = vector.load %arg6[%c0_110, %c0_111, %c3_112, %c0_113] : memref<1x1x4x128xf32, #tpu.memory_space<vmem>>, vector<1x1x1x128xf32>
    %138 = vector.shape_cast %137 : vector<1x1x1x128xf32> to vector<1x128xf32>
    %139 = arith.mulf %31, %31 : vector<2x128xf32>
    %cst_114 = arith.constant dense<0.000000e+00> : vector<128xf32>
    %140 = vector.multi_reduction <add>, %139, %cst_114 [0] : vector<2x128xf32> to vector<128xf32>
    %141 = vector.shape_cast %140 : vector<128xf32> to vector<1x128xf32>
    %142 = arith.addf %138, %141 : vector<1x128xf32>
    %c0_115 = arith.constant 0 : index
    %c0_116 = arith.constant 0 : index
    %c3_117 = arith.constant 3 : index
    %c0_118 = arith.constant 0 : index
    %143 = vector.load %arg6[%c0_115, %c0_116, %c3_117, %c0_118] : memref<1x1x4x128xf32, #tpu.memory_space<vmem>>, vector<1x1x1x128xf32>
    %144 = vector.shape_cast %143 : vector<1x1x1x128xf32> to vector<1x128xf32>
    %145 = vector.shape_cast %142 : vector<1x128xf32> to vector<1x1x1x128xf32>
    tpu.vector_store %arg6[%c0_115, %c0_116, %c3_117, %c0_118], %145 {strides = array<i32>} : memref<1x1x4x128xf32, #tpu.memory_space<vmem>>, vector<1x1x1x128xf32>,
    %c0_119 = arith.constant 0 : index
    %c0_120 = arith.constant 0 : index
    %c3_121 = arith.constant 3 : index
    %c0_122 = arith.constant 0 : index
    %146 = vector.load %arg7[%c0_119, %c0_120, %c3_121, %c0_122] : memref<1x1x4x128xf32, #tpu.memory_space<vmem>>, vector<1x1x1x128xf32>
    %147 = vector.shape_cast %146 : vector<1x1x1x128xf32> to vector<1x128xf32>
    %148 = arith.extui %126 : vector<2x128xi1> to vector<2x128xi32>
    %149 = arith.sitofp %148 : vector<2x128xi32> to vector<2x128xf32>
    %cst_123 = arith.constant dense<0.000000e+00> : vector<128xf32>
    %150 = vector.multi_reduction <add>, %149, %cst_123 [0] : vector<2x128xf32> to vector<128xf32>
    %151 = vector.shape_cast %150 : vector<128xf32> to vector<1x128xf32>
    %152 = arith.addf %147, %151 : vector<1x128xf32>
    %c0_124 = arith.constant 0 : index
    %c0_125 = arith.constant 0 : index
    %c3_126 = arith.constant 3 : index
    %c0_127 = arith.constant 0 : index
    %153 = vector.load %arg7[%c0_124, %c0_125, %c3_126, %c0_127] : memref<1x1x4x128xf32, #tpu.memory_space<vmem>>, vector<1x1x1x128xf32>
    %154 = vector.shape_cast %153 : vector<1x1x1x128xf32> to vector<1x128xf32>
    %155 = vector.shape_cast %152 : vector<1x128xf32> to vector<1x1x1x128xf32>
    tpu.vector_store %arg7[%c0_124, %c0_125, %c3_126, %c0_127], %155 {strides = array<i32>} : memref<1x1x4x128xf32, #tpu.memory_space<vmem>>, vector<1x1x1x128xf32>,
    return
  }
  func.func @transform_0(%arg0: i32, %arg1: i32, %arg2: i32) -> (i32, i32, i32, i32) {
    %c1_i32 = arith.constant 1 : i32
    %0 = arith.muli %arg1, %c1_i32 : i32
    %1 = arith.addi %0, %arg2 : i32
    %c0_i32 = arith.constant 0 : i32
    %c0_i32_0 = arith.constant 0 : i32
    %c0_i32_1 = arith.constant 0 : i32
    return %arg0, %c0_i32, %1, %c0_i32_0 : i32, i32, i32, i32
  }
  func.func @transform_1(%arg0: i32, %arg1: i32, %arg2: i32) -> (i32, i32, i32) {
    %c1_i32 = arith.constant 1 : i32
    %0 = arith.muli %arg1, %c1_i32 : i32
    %1 = arith.addi %0, %arg2 : i32
    %c0_i32 = arith.constant 0 : i32
    %c0_i32_0 = arith.constant 0 : i32
    return %arg0, %1, %c0_i32 : i32, i32, i32
  }
  func.func @transform_2(%arg0: i32, %arg1: i32, %arg2: i32) -> (i32, i32, i32, i32) {
    %c0_i32 = arith.constant 0 : i32
    %c0_i32_0 = arith.constant 0 : i32
    %c0_i32_1 = arith.constant 0 : i32
    return %arg0, %arg1, %c0_i32, %c0_i32_0 : i32, i32, i32, i32
  }
  func.func @transform_3(%arg0: i32, %arg1: i32, %arg2: i32) -> (i32, i32, i32, i32) {
    %c0_i32 = arith.constant 0 : i32
    %c0_i32_0 = arith.constant 0 : i32
    %c0_i32_1 = arith.constant 0 : i32
    return %arg0, %arg1, %c0_i32, %c0_i32_0 : i32, i32, i32, i32
  }
  func.func @transform_4(%arg0: i32, %arg1: i32, %arg2: i32) -> (i32, i32, i32, i32) {
    %c0_i32 = arith.constant 0 : i32
    %c0_i32_0 = arith.constant 0 : i32
    %c0_i32_1 = arith.constant 0 : i32
    return %arg0, %arg1, %c0_i32, %c0_i32_0 : i32, i32, i32, i32
  }
}

</mosaic_0001>

<bundles_post_ra>
// kernel: tpu_custom_call.1
= control target key start
LH: loop header
LB: loop body
LE: loop exit
PB: predicated region body
PF: predicated region fallthrough
CT: control target
= control target key end

     0   :  { %s1388_s0 = inlined_call_operand.hbm [shape: f32[2,4,2,128], index: 0, kind: input, shape index: {}]   ;;  %s1389_s1 = inlined_call_operand.hbm [shape: s32[2,2,128], index: 1, kind: input, shape index: {}]   ;;  %s1390_s2 = inlined_call_operand.hbm [shape: f32[2,1,4,128], index: 2, kind: output, shape index: {0}]   ;;  %s1391_s3 = inlined_call_operand.hbm [shape: f32[2,1,4,128], index: 3, kind: output, shape index: {1}]   ;;  %s1392_s4 = inlined_call_operand.hbm [shape: f32[2,1,4,128], index: 4, kind: output, shape index: {2}]  }
   0x1   :  { %1395 = sst [smem:[#allocation17_spill]] %s1388_s0 }
   0x2   :  { %10 = vsyncpa [#allocation3], 0 }
   0x3   :  { %12 = vsyncpa [#allocation3 + $0x1], 0 }
   0x4   :  { %13 = vsyncpa [#allocation6], 0 }
   0x5   :  { %15 = vsyncpa [#allocation6 + $0x1], 0 }
   0x6   :  { %16 = vsyncpa [#allocation4], 0 }
   0x7   :  { %18 = vsyncpa [#allocation4 + $0x1], 0 }
   0x8   :  { %19 = vsyncpa [#allocation9], 0 }
   0x9   :  { %21 = vsyncpa [#allocation9 + $0x1], 0  ;;  %s1067_s15 = smov 0   ;;  %s1069_s16 = smov 0  }
   0xa   :  { %s1071_s17 = smov 0   ;;  %s1073_s18 = smov 0  }
   0xb   :  { %s1075_s19 = smov 0   ;;  %s1077_s20 = smov 0  }
   0xc LB: > { %s1098_s21 = sadd.s32 4294967295, %s1032_s20   ;;  %s1393_s22 = sadd.s32 4294967294, %s1032_s20   ;;  %s1032_s20 = sphi %s1077_s20, %s27_s20   ;;  %s1028_s19 = sphi %s1075_s19, %s1412_s19   ;;  %s1024_s18 = sphi %s1073_s18, %s1411_s18   ;;  %s1020_s17 = sphi %s1071_s17, %s1410_s17   ;;  %s1016_s16 = sphi %s1069_s16, %s1409_s16   ;;  %s1012_s15 = sphi %s1067_s15, %s1408_s15  }
   0xd   : > { %s46_s23 = sadd.s32 1, %s1028_s19  ;;  %s57_s24 = sadd.s32 1, %s1020_s17 }
   0xe   : > { %p48_p0 = scmp.ge.s32.totalorder %s46_s23, 2  ;;  %p64_p1 = scmp.ne.s32.totalorder %s1020_s17, %s1016_s16 }
   0xf   : > { %p65_p2 = scmp.eq.s32.totalorder %s1032_s20, 0  ;;  %p70_p3 = scmp.ne.s32.totalorder %s1016_s16, %s1012_s15 }
  0x10   : > { %s1414_s23 = smov (%p48_p0, %s46_s23), 0  ;;  %p71_p5 = scmp.eq.s32.totalorder %s1098_s21, 0 }
  0x11   : > { %1396 = sst [smem:[#allocation15_spill]] %s1414_s23  ;;  %p1110_p4 = por %p65_p2, %p64_p1 }
  0x12   : > { %s52_s26 = ssub.s32 %s1028_s19, %s1414_s23  ;;  %p126_p6 = scmp.eq.s32.totalorder %s1098_s21, 1 }
  0x13   : > { %p55_p7 = scmp.eq.s32.totalorder %s52_s26, 0  ;;  %p1118_p8 = por %p71_p5, %p70_p3 }
  0x14   : > { %p1122_p9 = por %p126_p6, %p64_p1  ;;  %p132_p10 = scmp.eq.s32.totalorder %s1393_s22, 1 }
  0x15   : > { %s1129_s29 = scalar_select %p55_p7, %s1020_s17, %s57_s24  }
  0x16   : > { %p1131_p11 = por %p132_p10, %p70_p3  ;;  %p718_p12 = scmp.ge.s32.totalorder %s1032_s20, 2 }
  0x17   : > { %1400 = sst [smem:[#allocation16_spill]] %s1129_s29  ;;  %p773_p13 = scmp.lt.s32.totalorder %s1032_s20, 2 }
  0x18   : > { %s1138_s5 = sand.u32 1, %s1020_s17   ;;  %s745_s7 = sshll.u32 %s1028_s19, 7 }
  0x19   : > { %s719_s6 = sshll.u32 %s1138_s5, 3  ;;  %s1402_s0 = sld [smem:[#allocation17_spill]] }
  0x1a   : > { %s212_s11 = scalar_lea.vmem [#allocation2], %s719_s6  ;;  %p1147_p0 = pnand %p773_p13, %p1110_p4 }
  0x1b   : > { %s221_s12 = sshll.u32 %s212_s11, 4  ;;  %p724_p1 = scmp.ge.s32.totalorder %s1032_s20, 1  ;;  %s222_s12 = int_to_ptr.vmem [resolvable:$true] %s221_s12 }
  0x1c   : > { %s209_s14 = scalar_lea.sflag [#allocation3], %s1138_s5  ;;  %p838_p2 = pneg %p1147_p0 }
  0x1d   : > { %s849_s24 = scalar_lea.vmem %s222_s12, 128  ;;  %s1034_s26 = smov [#allocation2]  }
  0x1e   : > { %p850_p3 = scmp.ne.s32.totalorder %s222_s12, %s849_s24  ;;  %s854_s6 = sshll.u32 %s1034_s26, 4  ;;  %s855_s6 = int_to_ptr.vmem [resolvable:$false] %s854_s6 }
  0x1f   : > { %s220_s10 = scalar_lea.hbm %s1402_s0, %s745_s7  ;;  %s856_s25 = scalar_lea.vmem %s855_s6, 256 }
  0x20   : > { %p852_p5 = pnand %p850_p3, %p838_p2  ;;  %p857_p4 = scmp.lt.s32.totalorder %s222_s12, %s855_s6 }
  0x21   : > { %p858_p7 = scmp.lt.s32.totalorder %s856_s25, %s849_s24 }
  0x22   : > { %p853_p6 = pneg %p852_p5 }
  0x23   : > { %p859_p10 = por %p858_p7, %p857_p4 }
  0x25   : > { %p860_p13 = pnand %p859_p10, %p853_p6 }
  0x27   : > { %863 = shalt.err (!%p860_p13)
}
  0x28   : > { %s1035_s7 = smov 32   ;;  %s1036_s8 = smov 2  }
  0x29   : > { %759 = dma.hbm_to_vmem [thread:$0]  (!%p1147_p0), %s220_s10, 128, %s222_s12, %s209_s14, %s1035_s7, %s1035_s7, %s1036_s8  }
  0x2a   : > { %p249_p3 = scmp.lt.s32.totalorder %s1032_s20, 3  ;;  %s722_s9 = sshll.u32 %s1138_s5, 1 }
  0x2b   : > { %s723_s11 = sshll.u32 %s1028_s19, 5  ;;  %s235_s22 = scalar_lea.vmem [#allocation5], %s722_s9 }
  0x2c   : > { %p1165_p5 = pnand %p724_p1, %p249_p3  ;;  %s242_s25 = scalar_lea.hbm %s1389_s1, %s723_s11 }
  0x2d   : > { %s244_s0 = sshll.u32 %s235_s22, 4  ;;  %s232_s23 = scalar_lea.sflag [#allocation6], %s1138_s5  ;;  %s245_s0 = int_to_ptr.vmem [resolvable:$true] %s244_s0 }
  0x2e   : > { %s877_s29 = scalar_lea.vmem %s245_s0, 32  ;;  %s1037_s10 = smov [#allocation5]  }
  0x2f   : > { %p878_p6 = scmp.ne.s32.totalorder %s245_s0, %s877_s29  ;;  %s882_s12 = sshll.u32 %s1037_s10, 4  ;;  %s883_s12 = int_to_ptr.vmem [resolvable:$false] %s882_s12 }
  0x30   : > { %s884_s14 = scalar_lea.vmem %s883_s12, 64  ;;  %p885_p1 = scmp.lt.s32.totalorder %s245_s0, %s883_s12 }
  0x31   : > { %p880_p4 = pnand %p878_p6, %p838_p2  ;;  %p886_p10 = scmp.lt.s32.totalorder %s884_s14, %s877_s29 }
  0x33   : > { %p881_p7 = pneg %p880_p4  ;;  %p887_p13 = por %p886_p10, %p885_p1 }
  0x35   : > { %p888_p3 = pnand %p887_p13, %p881_p7 }
  0x37   : > { %891 = shalt.err (!%p888_p3)
}
  0x38   : > { %762 = dma.hbm_to_vmem [thread:$0]  (!%p1147_p0), %s242_s25, 32, %s245_s0, %s232_s23  }
  0x39   : > { %253 = sbr.rel (%p1165_p5) target bundleno = 197 (0xc5), region = 28  ;;  %s1181_s22 = sand.u32 (!%p1165_p5), 1, %s1016_s16  }
  0x3a   : > { %s725_s5 = sshll.u32 (!%p1165_p5), %s1181_s22, 3  ;;  %s256_s7 = scalar_lea.sflag (!%p1165_p5), [#allocation3], %s1181_s22 }
  0x3b   : > { %s259_s8 = scalar_lea.vmem (!%p1165_p5), [#allocation2], %s725_s5 }
  0x3e   : > { %995 = dma.done.wait (%p1118_p8), %s256_s7, 128  }
  0x3f   : > { %997 = vsyncadd (%p1118_p8), %s256_s7, 4294967168  ;;  %s726_s0 = sshll.u32 %s1181_s22, 1  ;;  %s265_s23 = scalar_lea.sflag [#allocation6], %s1181_s22 }
  0x40   : > { %s268_s29 = scalar_lea.vmem [#allocation5], %s726_s0 }
  0x41   : > { %999 = dma.done.wait (%p1118_p8), %s265_s23, 32  }
  0x42   : > { %1001 = vsyncadd (%p1118_p8), %s265_s23, 4294967264  ;;  %s727_s13 = sshll.u32 %s1181_s22, 2  ;;  %v1038_v0 = vmov 0.0   ;;  %v318_v1 = vld [vmem:[%s259_s8] sm:$0x3]  ;;  %vm351_vm0 = vcmask 1041408  }
  0x43   : > { %s1196_s9 = scalar_lea.vmem [#allocation8], %s727_s13  ;;  %s1199_s11 = scalar_lea.vmem [#allocation7], %s727_s13  ;;  %v730_v2 = vld [vmem:[%s259_s8 + $0x2] sm:$0x3]  ;;  %v731_v3 = vld [vmem:[%s259_s8 + $0x4] sm:$0x3] }
  0x44   : > { %315 = vst [vmem:[%s1196_s9] sm:$0xf] %v1038_v0  ;;  %314 = vst [vmem:[%s1199_s11] sm:$0xf] %v1038_v0  ;;  %s1202_s24 = scalar_lea.vmem [#allocation10], %s727_s13  ;;  %v325_v4 = vmax.f32 %v318_v1, %v730_v2  ;;  %v1205_v5 = vld [vmem:[%s268_s29] sm:$0x3]  ;;  %s494_s27 = sand.u32 1, %s1098_s21  }
  0x45   : > { %316 = vst [vmem:[%s1202_s24] sm:$0xf] %v1038_v0  ;;  %v732_v6 = vld [vmem:[%s259_s8 + $0x6] sm:$0x3]  ;;  %vm348_vm1 = vcmp.eq.s32.totalorder %v1205_v5, 0  ;;  %vm384_vm2 = vcmp.eq.s32.totalorder %v1205_v5, 1  ;;  %vm419_vm3 = vcmp.eq.s32.totalorder %v1205_v5, 2 }
  0x46   : > { %v326_v7 = vmax.f32 %v325_v4, %v731_v3  ;;  %v733_v8 = vsel %vm348_vm1, 1.0, %v1038_v0  ;;  %v734_v9 = vsel %vm384_vm2, 1.0, %v1038_v0  ;;  %v735_v21 = vsel %vm419_vm3, 1.0, %v1038_v0  ;;  %s1249_s26 = sshll.u32 %s1024_s18, 6  ;;  %s528_s6 = sshll.u32 %s1196_s9, 4  ;;  %s1270_s6 = int_to_ptr.vmem [resolvable:$true] %s528_s6 }
  0x47   : > { %v375_v11 = vsel %vm351_vm0, %v733_v8, 0.0  ;;  %v410_v12 = vsel %vm351_vm0, %v734_v9, 0.0  ;;  %vm454_vm4 = vcmp.eq.s32.totalorder %v1205_v5, 3  ;;  %v445_v28 = vsel %vm351_vm0, %v735_v21, 0.0  ;;  %s514_s18 = sshll.u32 %s1199_s11, 4  ;;  %s542_s25 = sshll.u32 %s1202_s24, 4  ;;  %s1278_s25 = int_to_ptr.vmem [resolvable:$true] %s542_s25  ;;  %s1290_s18 = int_to_ptr.vmem [resolvable:$true] %s514_s18 }
  0x48   : > { %v327_v10 = vmax.f32 %v326_v7, %v732_v6  ;;  %v376_v13 = vrot.slane %v375_v11, 4  ;;  %v411_v14 = vrot.slane %v410_v12, 4  ;;  %v446_v29 = vrot.slane %v445_v28, 4  ;;  %s1266_s14 = scalar_lea.hbm %s1391_s3, %s1249_s26  ;;  %s1276_s8 = scalar_lea.hbm %s1392_s4, %s1249_s26 }
  0x49   : > { %v736_v30 = vsel %vm454_vm4, 1.0, %v1038_v0  ;;  %s1288_s29 = scalar_lea.hbm %s1390_s2, %s1249_s26  ;;  %s1294_s13 = scalar_lea.sflag [#allocation9], %s494_s27 }
  0x4a   : > { %v328_v15 = vsub.f32 %v318_v1, %v327_v10  ;;  %v331_v16 = vsub.f32 %v730_v2, %v327_v10  ;;  %v334_v17 = vsub.f32 %v731_v3, %v327_v10  ;;  %v337_v18 = vsub.f32 %v732_v6, %v327_v10 }
  0x4b   : > { %v377_v19 = vadd.f32 %v376_v13, %v375_v11  ;;  %v412_v20 = vadd.f32 %v411_v14, %v410_v12  ;;  %v480_v33 = vsel %vm351_vm0, %v736_v30, 0.0  ;;  %v447_v34 = vadd.f32 %v446_v29, %v445_v28 }
  0x4c   : > { %v329_v22 = vmul.f32 1.442695, %v328_v15  ;;  %v332_v23 = vmul.f32 1.442695, %v331_v16  ;;  %v335_v24 = vmul.f32 1.442695, %v334_v17 }
  0x4d   : > { %v338_v25 = vmul.f32 1.442695, %v337_v18  ;;  %v378_v26 = vrot.slane %v377_v19, 2  ;;  %v413_v27 = vrot.slane %v412_v20, 2  ;;  %v481_v35 = vrot.slane %v480_v33, 4 }
  0x4e   : > { %826 = vpow2.f32 %v329_v22  ;;  %v372_v38 = vld [vmem:[%s1202_s24] sm:$0x1]  ;;  %v407_v39 = vld [vmem:[%s1202_s24 + $0x1] sm:$0x1]  ;;  %v448_v40 = vrot.slane %v447_v34, 2 }
  0x4f   : > { %828 = vpow2.f32 %v332_v23  ;;  %v379_v31 = vadd.f32 %v378_v26, %v377_v19  ;;  %v414_v32 = vadd.f32 %v413_v27, %v412_v20  ;;  %v482_v41 = vadd.f32 %v481_v35, %v480_v33  ;;  %v442_v50 = vld [vmem:[%s1202_s24 + $0x2] sm:$0x1]  ;;  %v477_v53 = vld [vmem:[%s1202_s24 + $0x3] sm:$0x1] }
  0x50   : > { %830 = vpow2.f32 %v335_v24  ;;  %v449_v44 = vadd.f32 %v448_v40, %v447_v34 }
  0x51   : > { %832 = vpow2.f32 %v338_v25  ;;  %v380_v36 = vrot.slane %v379_v31, 1  ;;  %v415_v37 = vrot.slane %v414_v32, 1  ;;  %v483_v45 = vrot.slane %v482_v41, 2 }
  0x52   : > { %v450_v48 = vrot.slane %v449_v44, 1 }
  0x53   : > { %v381_v42 = vadd.f32 %v380_v36, %v379_v31  ;;  %v416_v43 = vadd.f32 %v415_v37, %v414_v32  ;;  %v484_v49 = vadd.f32 %v483_v45, %v482_v41 }
  0x54   : > { %v451_v51 = vadd.f32 %v450_v48, %v449_v44 }
  0x55   : > { %v382_v46 = vadd.f32 %v381_v42, %v372_v38  ;;  %v417_v47 = vadd.f32 %v416_v43, %v407_v39  ;;  %v485_v52 = vrot.slane %v484_v49, 1 }
  0x56   : > { %v452_v54 = vadd.f32 %v451_v51, %v442_v50 }
  0x57   : > { %383 = vst [vmem:[%s1202_s24] sm:$0x1] %v382_v46  ;;  %418 = vst [vmem:[%s1202_s24 + $0x1] sm:$0x1] %v417_v47  ;;  %v486_v55 = vadd.f32 %v485_v52, %v484_v49  ;;  %v361_v49 = vld [vmem:[%s1196_s9] sm:$0x1] }
  0x58   : > { %453 = vst [vmem:[%s1202_s24 + $0x2] sm:$0x1] %v452_v54  ;;  %v396_v54 = vld [vmem:[%s1196_s9 + $0x1] sm:$0x1] }
  0x59   : > { %v487_v58 = vadd.f32 %v486_v55, %v477_v53  ;;  %v431_v55 = vld [vmem:[%s1196_s9 + $0x2] sm:$0x1] }
  0x5b   : > { %v827_v56 = vpop.eup %826  ;;  %488 = vst [vmem:[%s1202_s24 + $0x3] sm:$0x1] %v487_v58  ;;  %s892_s24 = scalar_lea.vmem %s1270_s6, 64 }
  0x5c   : > { %v829_v57 = vpop.eup %828  ;;  %p893_p8 = scmp.ne.s32.totalorder %s1270_s6, %s892_s24 }
  0x5d   : > { %v831_v59 = vpop.eup %830  ;;  %v340_v60 = vadd.f32 %v829_v57, %v827_v56 }
  0x5e   : > { %v833_v61 = vpop.eup %832  ;;  %p894_p0 = pnand %p893_p8, %p1122_p9 }
  0x5f   : > { %v341_v62 = vadd.f32 %v831_v59, %v340_v60 }
  0x60   : > { %p895_p2 = pneg %p894_p0 }
  0x61   : > { %v342_v63 = vadd.f32 %v833_v61, %v341_v62 }
  0x63   : > { %834 = vrcp.f32 %v342_v63 }
  0x70   : > { %v835_v0 = vpop.eup %834 }
  0x71   : > { %v344_v1 = vmul.f32 %v835_v0, %v827_v56  ;;  %v345_v2 = vmul.f32 %v835_v0, %v829_v57  ;;  %v346_v3 = vmul.f32 %v835_v0, %v831_v59  ;;  %v347_v4 = vmul.f32 %v835_v0, %v833_v61  ;;  %v466_v56 = vld [vmem:[%s1196_s9 + $0x3] sm:$0x1] }
  0x73   : > { %v362_v6 = vmul.f32 %v344_v1, %v344_v1  ;;  %v397_v7 = vmul.f32 %v345_v2, %v345_v2  ;;  %v432_v8 = vmul.f32 %v346_v3, %v346_v3  ;;  %v467_v9 = vmul.f32 %v347_v4, %v347_v4 }
  0x74   : > { %v350_v10 = vsel %vm348_vm1, %v344_v1, 0.0  ;;  %v386_v11 = vsel %vm384_vm2, %v345_v2, 0.0  ;;  %v421_v12 = vsel %vm419_vm3, %v346_v3, 0.0  ;;  %v456_v13 = vsel %vm454_vm4, %v347_v4, 0.0  ;;  %v349_v1 = vld [vmem:[%s1199_s11] sm:$0x1] }
  0x75   : > { %v363_v14 = vsel %vm351_vm0, %v362_v6, 0.0  ;;  %v398_v15 = vsel %vm351_vm0, %v397_v7, 0.0  ;;  %v433_v16 = vsel %vm351_vm0, %v432_v8, 0.0  ;;  %v468_v17 = vsel %vm351_vm0, %v467_v9, 0.0 }
  0x76   : > { %v364_v18 = vrot.slane %v363_v14, 4  ;;  %v399_v19 = vrot.slane %v398_v15, 4  ;;  %v434_v20 = vrot.slane %v433_v16, 4  ;;  %v469_v21 = vrot.slane %v468_v17, 4 }
  0x77   : > { %v352_v22 = vsel %vm351_vm0, %v350_v10, 0.0  ;;  %v387_v23 = vsel %vm351_vm0, %v386_v11, 0.0  ;;  %v422_v5 = vsel %vm351_vm0, %v421_v12, 0.0  ;;  %v457_v24 = vsel %vm351_vm0, %v456_v13, 0.0  ;;  %v385_v11 = vld [vmem:[%s1199_s11 + $0x1] sm:$0x1] }
  0x78   : > { %v365_v25 = vadd.f32 %v364_v18, %v363_v14  ;;  %v400_v26 = vadd.f32 %v399_v19, %v398_v15  ;;  %v435_v27 = vadd.f32 %v434_v20, %v433_v16  ;;  %v470_v28 = vadd.f32 %v469_v21, %v468_v17  ;;  %v420_v12 = vld [vmem:[%s1199_s11 + $0x2] sm:$0x1]  ;;  %v455_v13 = vld [vmem:[%s1199_s11 + $0x3] sm:$0x1] }
  0x79   : > { %v353_v29 = vrot.slane %v352_v22, 4  ;;  %v388_v30 = vrot.slane %v387_v23, 4  ;;  %v423_v31 = vrot.slane %v422_v5, 4  ;;  %v458_v32 = vrot.slane %v457_v24, 4 }
  0x7a   : > { %v366_v33 = vrot.slane %v365_v25, 2  ;;  %v401_v34 = vrot.slane %v400_v26, 2  ;;  %v436_v35 = vrot.slane %v435_v27, 2  ;;  %v471_v36 = vrot.slane %v470_v28, 2 }
  0x7b   : > { %v354_v37 = vadd.f32 %v353_v29, %v352_v22  ;;  %v389_v38 = vadd.f32 %v388_v30, %v387_v23  ;;  %v424_v39 = vadd.f32 %v423_v31, %v422_v5  ;;  %v459_v40 = vadd.f32 %v458_v32, %v457_v24 }
  0x7c   : > { %v367_v41 = vadd.f32 %v366_v33, %v365_v25  ;;  %v402_v42 = vadd.f32 %v401_v34, %v400_v26  ;;  %v437_v43 = vadd.f32 %v436_v35, %v435_v27  ;;  %v472_v44 = vadd.f32 %v471_v36, %v470_v28 }
  0x7d   : > { %v355_v45 = vrot.slane %v354_v37, 2  ;;  %v390_v46 = vrot.slane %v389_v38, 2  ;;  %v425_v47 = vrot.slane %v424_v39, 2  ;;  %v460_v48 = vrot.slane %v459_v40, 2 }
  0x7e   : > { %v368_v50 = vrot.slane %v367_v41, 1  ;;  %v403_v51 = vrot.slane %v402_v42, 1  ;;  %v438_v52 = vrot.slane %v437_v43, 1  ;;  %v473_v53 = vrot.slane %v472_v44, 1 }
  0x7f   : > { %v356_v57 = vadd.f32 %v355_v45, %v354_v37  ;;  %v391_v58 = vadd.f32 %v390_v46, %v389_v38  ;;  %v426_v59 = vadd.f32 %v425_v47, %v424_v39  ;;  %v461_v60 = vadd.f32 %v460_v48, %v459_v40 }
  0x80   : > { %v369_v61 = vadd.f32 %v368_v50, %v367_v41  ;;  %v404_v62 = vadd.f32 %v403_v51, %v402_v42  ;;  %v439_v63 = vadd.f32 %v438_v52, %v437_v43  ;;  %v474_v0 = vadd.f32 %v473_v53, %v472_v44 }
  0x81   : > { %v357_v2 = vrot.slane %v356_v57, 1  ;;  %v392_v3 = vrot.slane %v391_v58, 1  ;;  %v427_v4 = vrot.slane %v426_v59, 1  ;;  %v462_v6 = vrot.slane %v461_v60, 1 }
  0x82   : > { %v370_v7 = vadd.f32 %v369_v61, %v361_v49  ;;  %v405_v8 = vadd.f32 %v404_v62, %v396_v54  ;;  %v440_v9 = vadd.f32 %v439_v63, %v431_v55  ;;  %v475_v10 = vadd.f32 %v474_v0, %v466_v56 }
  0x83   : > { %v358_v14 = vadd.f32 %v357_v2, %v356_v57  ;;  %v393_v15 = vadd.f32 %v392_v3, %v391_v58  ;;  %v428_v16 = vadd.f32 %v427_v4, %v426_v59  ;;  %v463_v17 = vadd.f32 %v462_v6, %v461_v60 }
  0x84   : > { %371 = vst [vmem:[%s1196_s9] sm:$0x1] %v370_v7  ;;  %406 = vst [vmem:[%s1196_s9 + $0x1] sm:$0x1] %v405_v8 }
  0x85   : > { %441 = vst [vmem:[%s1196_s9 + $0x2] sm:$0x1] %v440_v9  ;;  %476 = vst [vmem:[%s1196_s9 + $0x3] sm:$0x1] %v475_v10  ;;  %v359_v18 = vadd.f32 %v358_v14, %v349_v1  ;;  %v394_v19 = vadd.f32 %v393_v15, %v385_v11  ;;  %v429_v20 = vadd.f32 %v428_v16, %v420_v12  ;;  %s1039_s9 = smov [#allocation8]  }
  0x86   : > { %v464_v21 = vadd.f32 %v463_v17, %v455_v13  ;;  %s896_s10 = sshll.u32 %s1039_s9, 4  ;;  %s897_s10 = int_to_ptr.vmem [resolvable:$false] %s896_s10 }
  0x87   : > { %s898_s12 = scalar_lea.vmem %s897_s10, 128  ;;  %p899_p5 = scmp.lt.s32.totalorder %s1270_s6, %s897_s10 }
  0x88   : > { %p900_p6 = scmp.lt.s32.totalorder %s898_s12, %s892_s24 }
  0x8a   : > { %p901_p4 = por %p900_p6, %p899_p5 }
  0x8c   : > { %p902_p7 = pnand %p901_p4, %p895_p2 }
  0x8e   : > { %905 = shalt.err (!%p902_p7)
}
  0x8f   : > { %s906_s21 = scalar_lea.hbm %s1266_s14, 64  ;;  %s910_s5 = scalar_lea.hbm %s1391_s3, 128 }
  0x90   : > { %p907_p1 = scmp.ne.s32.totalorder %s1266_s14, %s906_s21  ;;  %p911_p3 = scmp.lt.s32.totalorder %s1266_s14, %s1391_s3 }
  0x91   : > { %p912_p8 = scmp.lt.s32.totalorder %s910_s5, %s906_s21 }
  0x92   : > { %p908_p10 = pnand %p907_p1, %p1122_p9 }
  0x93   : > { %p913_p0 = por %p912_p8, %p911_p3 }
  0x94   : > { %p909_p13 = pneg %p908_p10 }
  0x96   : > { %p914_p2 = pnand %p913_p0, %p909_p13 }
  0x98   : > { %917 = shalt.err (!%p914_p2)
}
  0x99   : > { %751 = dma.vmem_to_hbm [thread:$0]  (%p1122_p9), %s1270_s6, 64, %s1266_s14, %s1294_s13  }
  0x9a   : > { %s918_s23 = scalar_lea.vmem %s1278_s25, 64  ;;  %s1040_s24 = smov [#allocation10]  }
  0x9b   : > { %p919_p5 = scmp.ne.s32.totalorder %s1278_s25, %s918_s23  ;;  %s922_s9 = sshll.u32 %s1040_s24, 4  ;;  %s923_s9 = int_to_ptr.vmem [resolvable:$false] %s922_s9 }
  0x9c   : > { %s924_s10 = scalar_lea.vmem %s923_s9, 128  ;;  %p925_p7 = scmp.lt.s32.totalorder %s1278_s25, %s923_s9 }
  0x9d   : > { %p920_p6 = pnand %p919_p5, %p1122_p9  ;;  %p926_p1 = scmp.lt.s32.totalorder %s924_s10, %s918_s23 }
  0x9f   : > { %p921_p4 = pneg %p920_p6  ;;  %p927_p10 = por %p926_p1, %p925_p7 }
  0xa1   : > { %p928_p13 = pnand %p927_p10, %p921_p4 }
  0xa3   : > { %931 = shalt.err (!%p928_p13)
}
  0xa4   : > { %s932_s12 = scalar_lea.hbm %s1276_s8, 64  ;;  %s936_s21 = scalar_lea.hbm %s1392_s4, 128 }
  0xa5   : > { %p933_p3 = scmp.ne.s32.totalorder %s1276_s8, %s932_s12  ;;  %p937_p2 = scmp.lt.s32.totalorder %s1276_s8, %s1392_s4 }
  0xa6   : > { %p938_p5 = scmp.lt.s32.totalorder %s936_s21, %s932_s12 }
  0xa7   : > { %p934_p8 = pnand %p933_p3, %p1122_p9 }
  0xa8   : > { %p939_p6 = por %p938_p5, %p937_p2 }
  0xa9   : > { %p935_p0 = pneg %p934_p8 }
  0xab   : > { %p940_p4 = pnand %p939_p6, %p935_p0 }
  0xad   : > { %943 = shalt.err (!%p940_p4)
}
  0xae   : > { %752 = dma.vmem_to_hbm [thread:$0]  (%p1122_p9), %s1278_s25, 64, %s1276_s8, %s1294_s13   ;;  %360 = vst [vmem:[%s1199_s11] sm:$0x1] %v359_v18  ;;  %395 = vst [vmem:[%s1199_s11 + $0x1] sm:$0x1] %v394_v19 }
  0xaf   : > { %430 = vst [vmem:[%s1199_s11 + $0x2] sm:$0x1] %v429_v20  ;;  %465 = vst [vmem:[%s1199_s11 + $0x3] sm:$0x1] %v464_v21  ;;  %s490_s5 = scalar_lea.sflag [#allocation4], %s1181_s22  ;;  %s944_s7 = scalar_lea.vmem %s1290_s18, 64 }
  0xb0   : > { %p945_p7 = scmp.ne.s32.totalorder %s1290_s18, %s944_s7  ;;  %s1041_s0 = smov [#allocation7]  }
  0xb1   : > { %s948_s23 = sshll.u32 %s1041_s0, 4  ;;  %s949_s23 = int_to_ptr.vmem [resolvable:$false] %s948_s23 }
  0xb2   : > { %p946_p1 = pnand %p945_p7, %p1122_p9  ;;  %s950_s24 = scalar_lea.vmem %s949_s23, 128 }
  0xb3   : > { %p951_p13 = scmp.lt.s32.totalorder %s1290_s18, %s949_s23  ;;  %p952_p3 = scmp.lt.s32.totalorder %s950_s24, %s944_s7 }
  0xb4   : > { %p947_p10 = pneg %p946_p1 }
  0xb5   : > { %p953_p8 = por %p952_p3, %p951_p13 }
  0xb7   : > { %p954_p0 = pnand %p953_p8, %p947_p10 }
  0xb9   : > { %957 = shalt.err (!%p954_p0)
}
  0xba   : > { %s958_s11 = scalar_lea.hbm %s1288_s29, 64  ;;  %s962_s8 = scalar_lea.hbm %s1390_s2, 128 }
  0xbb   : > { %p959_p2 = scmp.ne.s32.totalorder %s1288_s29, %s958_s11  ;;  %p963_p4 = scmp.lt.s32.totalorder %s1288_s29, %s1390_s2 }
  0xbc   : > { %p964_p7 = scmp.lt.s32.totalorder %s962_s8, %s958_s11 }
  0xbd   : > { %p960_p5 = pnand %p959_p2, %p1122_p9 }
  0xbe   : > { %p965_p1 = por %p964_p7, %p963_p4 }
  0xbf   : > { %p961_p6 = pneg %p960_p5 }
  0xc1   : > { %p966_p10 = pnand %p965_p1, %p961_p6 }
  0xc3   : > { %969 = shalt.err (!%p966_p10)
}
  0xc4   : > { %750 = dma.vmem_to_hbm [thread:$0]  (%p1122_p9), %s1290_s18, 64, %s1288_s29, %s490_s5  }
  0xc5 PF: > { %s554_s10 = sand.u32 1, %s1012_s15   ;;  %p764_p13 = pnand %p718_p12, %p1131_p11 }
  0xc6   : > { %s555_s12 = scalar_lea.sflag [#allocation4], %s554_s10 }
  0xc7   : > { %p765_p3 = pneg %p764_p13 }
  0xc9   : > { %1003 = dma.done.wait (%p765_p3), %s555_s12, 64  }
  0xca   : > { %1005 = vsyncadd (%p765_p3), %s555_s12, 4294967232  ;;  %s1405_s6 = sadd.s32 4294967294, %s1032_s20  }
  0xcb   : > { %s563_s14 = sand.u32 1, %s1405_s6  }
  0xcc   : > { %s564_s21 = scalar_lea.sflag [#allocation9], %s563_s14 }
  0xcd   : > { %1007 = dma.done.wait (%p765_p3), %s564_s21, 128  }
  0xce   : > { %1009 = vsyncadd (%p765_p3), %s564_s21, 4294967168  ;;  %s27_s20 = sadd.s32 1, %s1032_s20   ;;  %s1406_s28 = sld [smem:[#allocation16_spill]] }
  0xcf   : > { %p24_p9 = scmp.ge.s32.totalorder %s27_s20, 4   ;;  %s1407_s30 = sld [smem:[#allocation15_spill]] }
  0xd0   : > { %s1408_s15 = smov %s1016_s16  ;;  %s1409_s16 = smov %s1020_s17 }
  0xd1   : > { %s1411_s18 = smov %s1028_s19  ;;  %26 = sbr.rel (!%p24_p9) target bundleno = 12 (0xc), region = 125 }
  0xd4   : > { %s1410_s17 = smov %s1406_s28 }
  0xd5   : > { %s1412_s19 = smov %s1407_s30 }
  0xd6   :  { %578 = vsyncpa [#allocation3], 1 }
  0xd7   :  { %580 = vsyncpa [#allocation3 + $0x1], 1 }
  0xd8   :  { %581 = vsyncpa [#allocation6], 1 }
  0xd9   :  { %583 = vsyncpa [#allocation6 + $0x1], 1 }
  0xda   :  { %584 = vsyncpa [#allocation4], 1 }
  0xdb   :  { %586 = vsyncpa [#allocation4 + $0x1], 1 }
  0xdc   :  { %587 = vsyncpa [#allocation9], 1 }
  0xdd   :  { %589 = vsyncpa [#allocation9 + $0x1], 1 }

</bundles_post_ra>
